<compile_context>
chip_gen: v6e
topology: v6e:2x2x1
jax: 0.10.0
libtpu: 0.0.40
codegen_flags: <defaults>
</compile_context>

<pallas_src>
import jax
import jax.numpy as jnp
from jax.experimental import pallas as pl
from jax.experimental.pallas import tpu as pltpu

H = 32  # per-branch hidden size (torch: Linear(T, 32))


def fused_residual_kernel(up_ref, dn_ref, w_ref, s_ref, o_ref):
    """Fused ResidualBlock forward on one batch tile (transposed layout).

    up_ref, dn_ref: [T, tb]   raw (unscaled) inputs, time on sublanes, batch on lanes
    w_ref:          [40, 128] packed param slab (scaler folded, layer-2 rows *0.5):
                      rows 0:32, cols 0:T    -> W11'^T
                      rows 0:32, cols T:2T   -> W21'^T
                      rows 0:32, col  2T     -> b11'   (layer-1 upstream bias)
                      rows 0:32, col  2T+1   -> b21'   (layer-1 downstream bias)
                      row  32,   cols 0:32   -> 0.5 * w12^T
                      row  33,   cols 0:32   -> 0.5 * w22^T
    s_ref:          [5] SMEM  scalars: 0.5*b12, 0.5*b22, 0.5*w3_up, 0.5*w3_dn,
                              b3 + 0.5*(w3_up + w3_dn)
    o_ref:          [1, tb]   lane-dense output row (wrapper transposes to [B, 1])
    """
    t = up_ref.shape[0]  # T (static)

    w1u = w_ref[0:H, 0:t]                      # [32, T]
    w1d = w_ref[0:H, t:2 * t]                  # [32, T]
    b1u = w_ref[0:H, 2 * t:2 * t + 1]          # [32, 1]
    b1d = w_ref[0:H, 2 * t + 1:2 * t + 2]      # [32, 1]
    w2u = w_ref[H:H + 1, 0:H]                  # [1, 32]  (pre-scaled by 0.5)
    w2d = w_ref[H + 1:H + 2, 0:H]              # [1, 32]

    # Layer 1 (per branch) + ReLU.
    h_up = jnp.maximum(
        jnp.dot(w1u, up_ref[...], preferred_element_type=jnp.float32) + b1u, 0.0)
    h_dn = jnp.maximum(
        jnp.dot(w1d, dn_ref[...], preferred_element_type=jnp.float32) + b1d, 0.0)

    # Layer 2: lane-dense [1, tb] results (already scaled by 0.5 for the tanh form).
    z_up = jnp.dot(w2u, h_up, preferred_element_type=jnp.float32)
    z_dn = jnp.dot(w2d, h_dn, preferred_element_type=jnp.float32)

    # sigmoid + linear3 with all constants folded host-side:
    #   out = c_up*tanh(z_up + bu) + c_dn*tanh(z_dn + bd) + c0
    o_ref[...] = (s_ref[2] * jnp.tanh(z_up + s_ref[0])
                  + s_ref[3] * jnp.tanh(z_dn + s_ref[1])
                  + s_ref[4])


def fuse_params(p):
    """Fold the scaler into layer-1, fold sigmoid/linear3 constants, and pack
    everything into one lane-padded VMEM slab + one SMEM scalar vector."""
    T = p["w11"].shape[0]
    inv = 1.0 / p["scale"]                                  # [1, T]
    w11f = p["w11"] * inv.T                                 # diag(1/scale) @ W11
    w21f = p["w21"] * inv.T
    b11f = (p["b11"] - (p["mean"] * inv) @ p["w11"]).reshape(-1)   # [32]
    b21f = (p["b21"] - (p["mean"] * inv) @ p["w21"]).reshape(-1)

    width = max(128, 2 * T + 2, H)
    width = ((width + 127) // 128) * 128                    # lane-padded slab
    rows = ((H + 2 + 7) // 8) * 8                           # 40 (sublane-padded)
    slab = jnp.zeros((rows, width), jnp.float32)
    slab = slab.at[0:H, 0:T].set(w11f.T)
    slab = slab.at[0:H, T:2 * T].set(w21f.T)
    slab = slab.at[0:H, 2 * T].set(b11f)
    slab = slab.at[0:H, 2 * T + 1].set(b21f)
    # sigmoid(t) = 0.5*tanh(t/2)+0.5  ->  pre-scale layer-2 rows/biases by 0.5 and
    # absorb the +0.5 terms plus w3/b3 into scalars.
    slab = slab.at[H, 0:H].set(0.5 * p["w12"][:, 0])
    slab = slab.at[H + 1, 0:H].set(0.5 * p["w22"][:, 0])

    w3u = p["w3"][0, 0]
    w3d = p["w3"][1, 0]
    scalars = jnp.array([
        0.5 * p["b12"][0, 0],                 # bu
        0.5 * p["b22"][0, 0],                 # bd
        0.5 * w3u,                            # c_up
        0.5 * w3d,                            # c_dn
        p["b3"][0, 0] + 0.5 * (w3u + w3d),    # c0
    ], jnp.float32)
    return slab, scalars


def _parallel_steps_hint():
    """>=2 on chips where one Pallas kernel can shard a 'parallel' axis across two
    TensorCores (v7x / megacore); 1 on single-TC chips (v5e / v6e)."""
    try:
        kind = jax.devices()[0].device_kind.lower()
    except Exception:
        return 1
    if ("v7" in kind) or ("7x" in kind) or ("v4" in kind) or ("v5p" in kind):
        return 2
    return 1


def _pick_tile(batch, hint):
    """Largest multiple-of-128 batch tile (<= 2048 lanes) honoring the per-chip
    grid-length hint: >= `hint` steps on multi-TC chips, fewest steps otherwise."""
    b_pad = ((batch + 127) // 128) * 128
    tb = min(b_pad, 2048)
    if hint > 1:
        per_step = max(128, ((b_pad // hint) // 128) * 128)
        tb = min(tb, per_step)
    return max(128, (tb // 128) * 128)


def residual_block_forward(upstream_t, downstream_t, slab, scalars):
    """upstream_t, downstream_t: [T, B] float32 (raw, time-major). Returns [B, 1]."""
    T, B = upstream_t.shape
    hint = _parallel_steps_hint()
    tb = _pick_tile(B, hint)
    b_pad = ((B + tb - 1) // tb) * tb          # cdiv-style: padded tail tile
    if b_pad != B:
        pad = ((0, 0), (0, b_pad - B))
        upstream_t = jnp.pad(upstream_t, pad)
        downstream_t = jnp.pad(downstream_t, pad)
    grid = (b_pad // tb,)

    cost = pl.CostEstimate(
        flops=int(b_pad * (4 * T * H + 4 * H + 8)),
        transcendentals=int(2 * b_pad),
        bytes_accessed=int((2 * T * b_pad + b_pad) * 4 + slab.size * 4 + scalars.size * 4),
    )

    out_t = pl.pallas_call(
        fused_residual_kernel,
        out_shape=jax.ShapeDtypeStruct((1, b_pad), jnp.float32),
        grid_spec=pltpu.PrefetchScalarGridSpec(
            num_scalar_prefetch=0,
            grid=grid,
            in_specs=[
                pl.BlockSpec((T, tb), lambda i: (0, i)),            # upstream tile
                pl.BlockSpec((T, tb), lambda i: (0, i)),            # downstream tile
                pl.BlockSpec(slab.shape, lambda i: (0, 0)),         # params, resident
                pl.BlockSpec(memory_space=pltpu.MemorySpace.SMEM),  # folded scalars
            ],
            out_specs=pl.BlockSpec((1, tb), lambda i: (0, i)),
        ),
        compiler_params=pltpu.CompilerParams(
            dimension_semantics=("parallel",)),
        cost_estimate=cost,
    )(upstream_t, downstream_t, slab, scalars)
    return out_t[:, :B].T                                           # [B, 1]


def init_params(key, num_timesteps_input):
    T = num_timesteps_input
    ks = jax.random.split(key, 10)
    scale_init = lambda k, shape, fan_in: (
        jax.random.uniform(k, shape, jnp.float32, -1.0, 1.0) / jnp.sqrt(float(fan_in)))
    return {
        # deterministic synthetic scaler stats (standard scaling)
        "mean":  jnp.linspace(-0.5, 0.5, T, dtype=jnp.float32).reshape(1, T),
        "scale": jnp.linspace(0.8, 1.2, T, dtype=jnp.float32).reshape(1, T),
        "w11": scale_init(ks[0], (T, 32), T),   "b11": scale_init(ks[1], (1, 32), T),
        "w12": scale_init(ks[2], (32, 1), 32),  "b12": scale_init(ks[3], (1, 1), 32),
        "w21": scale_init(ks[4], (T, 32), T),   "b21": scale_init(ks[5], (1, 32), T),
        "w22": scale_init(ks[6], (32, 1), 32),  "b22": scale_init(ks[7], (1, 1), 32),
        "w3":  scale_init(ks[8], (2, 1), 2),    "b3":  scale_init(ks[9], (1, 1), 2),
    }


def reference_forward(upstream, downstream, p):
    hp = jax.lax.Precision.HIGHEST
    up = (upstream - p["mean"]) / p["scale"]
    dn = (downstream - p["mean"]) / p["scale"]
    h_up = jnp.maximum(jnp.dot(up, p["w11"], precision=hp) + p["b11"], 0.0)
    x_up = jax.nn.sigmoid(jnp.dot(h_up, p["w12"], precision=hp) + p["b12"])
    h_dn = jnp.maximum(jnp.dot(dn, p["w21"], precision=hp) + p["b21"], 0.0)
    x_dn = jax.nn.sigmoid(jnp.dot(h_dn, p["w22"], precision=hp) + p["b22"])
    x = jnp.concatenate([x_up, x_dn], axis=1)
    return jnp.dot(x, p["w3"], precision=hp) + p["b3"]


if __name__ == "__main__":
    B, T = 256, 8                      # batch 256, num_timesteps_input = 8
    key = jax.random.PRNGKey(0)
    k_up, k_dn, k_par = jax.random.split(key, 3)
    # Producer emits time-major [T, B] layout directly -> no wrapper-side
    # concat/transpose HBM pass (layout plumbing only).
    upstream_t = jax.random.normal(k_up, (T, B), jnp.float32)
    downstream_t = jax.random.normal(k_dn, (T, B), jnp.float32)
    params = init_params(k_par, T)

    slab, scalars = fuse_params(params)
    fwd = jax.jit(residual_block_forward)
    out = jax.block_until_ready(fwd(upstream_t, downstream_t, slab, scalars))

    ref = reference_forward(upstream_t.T, downstream_t.T, params)
    assert out.shape == (B, 1)
    max_err = float(jnp.max(jnp.abs(out - ref)))
    # Tolerance accounts for MXU f32-via-bf16-pass rounding vs HIGHEST-precision ref.
    assert max_err < 1e-3, f"mismatch vs JAX reference, max_err={max_err}"
    print("KERNEL_OK")
</pallas_src>

<mosaic_0001>
module attributes {stable_mosaic.version = 11 : i64} {
  func.func @fused_residual_kernel(%arg0: i32, %arg1: memref<8x256xf32, #tpu.memory_space<vmem>>, %arg2: memref<8x256xf32, #tpu.memory_space<vmem>>, %arg3: memref<40x128xf32, #tpu.memory_space<vmem>>, %arg4: memref<5xf32, #tpu.memory_space<smem>>, %arg5: memref<1x256xf32, #tpu.memory_space<vmem>>) attributes {dimension_semantics = [#tpu.dimension_semantics<parallel>], iteration_bounds = array<i64: 1>, scalar_prefetch = 0 : i64, scratch_operands = 0 : i64, tpu.core_type = #tpu.core_type<tc>, window_params = [{transform_indices = @transform_0, window_bounds = array<i64: 8, 256>}, {transform_indices = @transform_1, window_bounds = array<i64: 8, 256>}, {pipeline_mode = #tpu.pipeline_mode<synchronous>, transform_indices = @transform_2, window_bounds = array<i64: 40, 128>}, {transform_indices = @transform_3, window_bounds = array<i64: 5>}, {transform_indices = @transform_4, window_bounds = array<i64: 1, 256>}]} {
    %c0 = arith.constant 0 : index
    %c0_0 = arith.constant 0 : index
    %0 = vector.load %arg3[%c0, %c0_0] : memref<40x128xf32, #tpu.memory_space<vmem>>, vector<32x8xf32>
    %c0_1 = arith.constant 0 : index
    %c8 = arith.constant 8 : index
    %1 = vector.load %arg3[%c0_1, %c8] : memref<40x128xf32, #tpu.memory_space<vmem>>, vector<32x8xf32>
    %c0_2 = arith.constant 0 : index
    %c16 = arith.constant 16 : index
    %2 = vector.load %arg3[%c0_2, %c16] : memref<40x128xf32, #tpu.memory_space<vmem>>, vector<32x1xf32>
    %c0_3 = arith.constant 0 : index
    %c17 = arith.constant 17 : index
    %3 = vector.load %arg3[%c0_3, %c17] : memref<40x128xf32, #tpu.memory_space<vmem>>, vector<32x1xf32>
    %c32 = arith.constant 32 : index
    %c0_4 = arith.constant 0 : index
    %4 = vector.load %arg3[%c32, %c0_4] : memref<40x128xf32, #tpu.memory_space<vmem>>, vector<1x32xf32>
    %c33 = arith.constant 33 : index
    %c0_5 = arith.constant 0 : index
    %5 = vector.load %arg3[%c33, %c0_5] : memref<40x128xf32, #tpu.memory_space<vmem>>, vector<1x32xf32>
    %c0_6 = arith.constant 0 : index
    %c0_7 = arith.constant 0 : index
    %6 = vector.load %arg1[%c0_6, %c0_7] : memref<8x256xf32, #tpu.memory_space<vmem>>, vector<8x256xf32>
    %cst = arith.constant dense<0.000000e+00> : vector<32x256xf32>
    %7 = tpu.matmul %0, %6, %cst {dimension_numbers = #tpu.dot_dimension_numbers<[1], [0], [0], [1], [0, 0, 1, 1], [], []>} : vector<32x8xf32>, vector<8x256xf32>, vector<32x256xf32> -> vector<32x256xf32>
    %8 = vector.broadcast %2 : vector<32x1xf32> to vector<32x256xf32>
    %9 = arith.addf %7, %8 : vector<32x256xf32>
    %cst_8 = arith.constant 0.000000e+00 : f32
    %10 = vector.broadcast %cst_8 : f32 to vector<32x256xf32>
    %11 = arith.maximumf %9, %10 : vector<32x256xf32>
    %c0_9 = arith.constant 0 : index
    %c0_10 = arith.constant 0 : index
    %12 = vector.load %arg2[%c0_9, %c0_10] : memref<8x256xf32, #tpu.memory_space<vmem>>, vector<8x256xf32>
    %cst_11 = arith.constant dense<0.000000e+00> : vector<32x256xf32>
    %13 = tpu.matmul %1, %12, %cst_11 {dimension_numbers = #tpu.dot_dimension_numbers<[1], [0], [0], [1], [0, 0, 1, 1], [], []>} : vector<32x8xf32>, vector<8x256xf32>, vector<32x256xf32> -> vector<32x256xf32>
    %14 = vector.broadcast %3 : vector<32x1xf32> to vector<32x256xf32>
    %15 = arith.addf %13, %14 : vector<32x256xf32>
    %cst_12 = arith.constant 0.000000e+00 : f32
    %16 = vector.broadcast %cst_12 : f32 to vector<32x256xf32>
    %17 = arith.maximumf %15, %16 : vector<32x256xf32>
    %cst_13 = arith.constant dense<0.000000e+00> : vector<1x256xf32>
    %18 = tpu.matmul %4, %11, %cst_13 {dimension_numbers = #tpu.dot_dimension_numbers<[1], [0], [0], [1], [0, 0, 1, 1], [], []>} : vector<1x32xf32>, vector<32x256xf32>, vector<1x256xf32> -> vector<1x256xf32>
    %cst_14 = arith.constant dense<0.000000e+00> : vector<1x256xf32>
    %19 = tpu.matmul %5, %17, %cst_14 {dimension_numbers = #tpu.dot_dimension_numbers<[1], [0], [0], [1], [0, 0, 1, 1], [], []>} : vector<1x32xf32>, vector<32x256xf32>, vector<1x256xf32> -> vector<1x256xf32>
    %c2 = arith.constant 2 : index
    %20 = memref.load %arg4[%c2] : memref<5xf32, #tpu.memory_space<smem>>
    %c0_15 = arith.constant 0 : index
    %21 = memref.load %arg4[%c0_15] : memref<5xf32, #tpu.memory_space<smem>>
    %22 = vector.broadcast %21 : f32 to vector<1x256xf32>
    %23 = arith.addf %18, %22 : vector<1x256xf32>
    %24 = math.tanh %23 : vector<1x256xf32>
    %25 = vector.broadcast %20 : f32 to vector<1x256xf32>
    %26 = arith.mulf %25, %24 : vector<1x256xf32>
    %c3 = arith.constant 3 : index
    %27 = memref.load %arg4[%c3] : memref<5xf32, #tpu.memory_space<smem>>
    %c1 = arith.constant 1 : index
    %28 = memref.load %arg4[%c1] : memref<5xf32, #tpu.memory_space<smem>>
    %29 = vector.broadcast %28 : f32 to vector<1x256xf32>
    %30 = arith.addf %19, %29 : vector<1x256xf32>
    %31 = math.tanh %30 : vector<1x256xf32>
    %32 = vector.broadcast %27 : f32 to vector<1x256xf32>
    %33 = arith.mulf %32, %31 : vector<1x256xf32>
    %34 = arith.addf %26, %33 : vector<1x256xf32>
    %c4 = arith.constant 4 : index
    %35 = memref.load %arg4[%c4] : memref<5xf32, #tpu.memory_space<smem>>
    %36 = vector.broadcast %35 : f32 to vector<1x256xf32>
    %37 = arith.addf %34, %36 : vector<1x256xf32>
    %c0_16 = arith.constant 0 : index
    %c0_17 = arith.constant 0 : index
    %38 = vector.load %arg5[%c0_16, %c0_17] : memref<1x256xf32, #tpu.memory_space<vmem>>, vector<1x256xf32>
    tpu.vector_store %arg5[%c0_16, %c0_17], %37 {strides = array<i32>} : memref<1x256xf32, #tpu.memory_space<vmem>>, vector<1x256xf32>,
    return
  }
  func.func @transform_0(%arg0: i32) -> (i32, i32) {
    %c0_i32 = arith.constant 0 : i32
    %c0_i32_0 = arith.constant 0 : i32
    return %c0_i32, %arg0 : i32, i32
  }
  func.func @transform_1(%arg0: i32) -> (i32, i32) {
    %c0_i32 = arith.constant 0 : i32
    %c0_i32_0 = arith.constant 0 : i32
    return %c0_i32, %arg0 : i32, i32
  }
  func.func @transform_2(%arg0: i32) -> (i32, i32) {
    %c0_i32 = arith.constant 0 : i32
    %c0_i32_0 = arith.constant 0 : i32
    %c0_i32_1 = arith.constant 0 : i32
    return %c0_i32, %c0_i32_0 : i32, i32
  }
  func.func @transform_3(%arg0: i32) -> i32 {
    %c0_i32 = arith.constant 0 : i32
    %c0_i32_0 = arith.constant 0 : i32
    return %c0_i32 : i32
  }
  func.func @transform_4(%arg0: i32) -> (i32, i32) {
    %c0_i32 = arith.constant 0 : i32
    %c0_i32_0 = arith.constant 0 : i32
    return %c0_i32, %arg0 : i32, i32
  }
}

</mosaic_0001>

<bundles_post_ra>
// kernel: residual_block_forward.1
= control target key start
LH: loop header
LB: loop body
LE: loop exit
PB: predicated region body
PF: predicated region fallthrough
CT: control target
= control target key end

     0   :  { %9 = vsyncpa [#allocation3], 0  ;;  %s747_s0 = inlined_call_operand.hbm [shape: f32[8,256], index: 0, kind: input, shape index: {}]   ;;  %s748_s1 = inlined_call_operand.hbm [shape: f32[8,256], index: 1, kind: input, shape index: {}]   ;;  %s749_s2 = inlined_call_operand.hbm [shape: f32[40,128], index: 2, kind: input, shape index: {}]   ;;  %s750_s3 = inlined_call_operand.vmem [shape: f32[5], index: 3, kind: input, shape index: {}]   ;;  %s751_s4 = inlined_call_operand.hbm [shape: f32[1,256], index: 4, kind: output, shape index: {}]  }
   0x1   :  { %10 = vsyncpa [#allocation7], 0 }
   0x2   :  { %11 = vsyncpa [#allocation5], 0 }
   0x3   :  { %12 = vsyncpa [#allocation4], 0  ;;  %s685_s15 = smov [#allocation6]   ;;  %s686_s17 = smov [#allocation2]  }
   0x4   :  { %s29_s16 = sshll.u32 %s685_s15, 4  ;;  %s19_s18 = sshll.u32 %s686_s17, 4  ;;  %s30_s16 = int_to_ptr.vmem [resolvable:$true] %s29_s16  ;;  %s20_s18 = int_to_ptr.vmem [resolvable:$true] %s19_s18 }
   0x5   :  { %s593_s19 = scalar_lea.vmem %s30_s16, 256  ;;  %p598_p1 = scmp.lt.s32.totalorder %s30_s16, %s30_s16 }
   0x6   :  { %p594_p0 = scmp.ne.s32.totalorder %s30_s16, %s593_s19  ;;  %p599_p2 = scmp.lt.s32.totalorder %s593_s19, %s593_s19 }
   0x8   :  { %p600_p3 = por %p599_p2, %p598_p1 }
   0xa   :  { %p601_p4 = pnand %p600_p3, %p594_p0 }
   0xc   :  { %604 = shalt.err (!%p601_p4)
}
   0xd   :  { %32 = dma.hbm_to_vmem [thread:$0]  %s748_s1, 256, %s30_s16, [#allocation7]  }
   0xe   :  { %s613_s22 = scalar_lea.vmem %s20_s18, 256  ;;  %p618_p6 = scmp.lt.s32.totalorder %s20_s18, %s20_s18 }
   0xf   :  { %p614_p5 = scmp.ne.s32.totalorder %s20_s18, %s613_s22  ;;  %p619_p7 = scmp.lt.s32.totalorder %s613_s22, %s613_s22 }
  0x11   :  { %p620_p8 = por %p619_p7, %p618_p6 }
  0x13   :  { %p621_p9 = pnand %p620_p8, %p614_p5 }
  0x15   :  { %624 = shalt.err (!%p621_p9)
}
  0x16   :  { %22 = dma.hbm_to_vmem [thread:$0]  %s747_s0, 256, %s20_s18, [#allocation3]  }
  0x17   :  { %s687_s25 = smov [#allocation8]   ;;  %s51_s29 = sshll.u32 %s750_s3, 4  ;;  %s52_s29 = int_to_ptr.vmem [resolvable:$true] %s51_s29 }
  0x18   :  { %s38_s26 = sshll.u32 %s687_s25, 4  ;;  %s39_s26 = int_to_ptr.vmem [resolvable:$true] %s38_s26 }
  0x19   :  { %s633_s30 = scalar_lea.vmem %s39_s26, 640  ;;  %p638_p11 = scmp.lt.s32.totalorder %s39_s26, %s39_s26 }
  0x1a   :  { %p634_p10 = scmp.ne.s32.totalorder %s39_s26, %s633_s30  ;;  %p639_p12 = scmp.lt.s32.totalorder %s633_s30, %s633_s30 }
  0x1c   :  { %p640_p13 = por %p639_p12, %p638_p11 }
  0x1e   :  { %p641_p0 = pnand %p640_p13, %p634_p10 }
  0x20   :  { %644 = shalt.err (!%p641_p0)
}
  0x21   :  { %s688_s1 = smov 128   ;;  %s689_s5 = smov 8  }
  0x22   :  { %44 = dma.hbm_to_vmem [thread:$0]  %s749_s2, 640, %s39_s26, [#allocation7], %s688_s1, %s688_s1, %s689_s5  }
  0x23   :  { %s645_s0 = scalar_lea.vmem %s52_s29, 16  ;;  %p650_p2 = scmp.lt.s32.totalorder %s52_s29, %s52_s29 }
  0x24   :  { %p646_p1 = scmp.ne.s32.totalorder %s52_s29, %s645_s0  ;;  %p651_p3 = scmp.lt.s32.totalorder %s645_s0, %s645_s0 }
  0x26   :  { %p652_p4 = por %p651_p3, %p650_p2 }
  0x28   :  { %p653_p5 = pnand %p652_p4, %p646_p1 }
  0x2a   :  { %656 = shalt.err (!%p653_p5)
}
  0x2b   :  { %s690_s3 = smov [#allocation9]  }
  0x2c   :  { %54 = dma.vmem_to_smem %s52_s29, 16, %s690_s3, [#allocation5]  }
  0x2d   :  { %677 = dma.done.wait [#allocation3], 256  }
  0x2e   :  { %678 = vsyncadd [#allocation3], 4294967040 }
  0x2f   :  { %679 = dma.done.wait [#allocation7], 896  }
  0x30   :  { %680 = vsyncadd [#allocation7], 4294966400 }
  0x31   :  { %681 = dma.done.wait [#allocation5], 16  }
  0x32   :  { %682 = vsyncadd [#allocation5], 4294967280 }
  0x33   :  { %67 = sfence }
  0x34   :  { %v68_v0 = vld [vmem:[#allocation8] sm:$0xff]  ;;  %v70_v1 = vld [vmem:[#allocation8 + $0x10] sm:$0xff]  ;;  %s691_s2 = smov 120   ;;  %v69_v2 = vld [vmem:[#allocation8 + $0x8] sm:$0xff]  ;;  %vm96_vm0 = vcmask 64512   ;;  %v692_v6 = vmov 0.0  }
  0x35   :  { %220 = vrot.lane.b32.xlu0 %v68_v0, %s691_s2  ;;  %224 = vrot.lane.b32.xlu1 %v70_v1, %s691_s2  ;;  %v75_v3 = vld [vmem:[#allocation2 + $0x8] sm:$0xff]  ;;  %v74_v4 = vld [vmem:[#allocation2] sm:$0xff]  ;;  %v71_v5 = vld [vmem:[#allocation8 + $0x18] sm:$0xff]  ;;  %v693_v9 = vmov 17   ;;  %v694_v10 = vmov 16   ;;  %vm336_vm1 = vcmask 261120  }
  0x36   :  { %135 = vmatprep.subr.mxu0 %v75_v3  ;;  %169 = vmatprep.mubr.f32.mxu0 %v692_v6  ;;  %v203_v7 = vld [vmem:[#allocation6 + $0x8] sm:$0xff]  ;;  %v202_v8 = vld [vmem:[#allocation6] sm:$0xff]  ;;  %v72_v45 = vld [vmem:[#allocation8 + $0x20] sm:$0x1]  ;;  %s334_s8 = sld [smem:[#allocation9]]  ;;  %s696_s13 = smov [#allocation10]  }
  0x37   :  { %136 = vmatpush1.msra.mxu0 %v74_v4  ;;  %266 = vmatprep.subr.mxu1 %v203_v7  ;;  %s555_s9 = sld [smem:[#allocation9 + $0x1]]  ;;  %s533_s14 = sshll.u32 %s696_s13, 4  ;;  %s534_s14 = int_to_ptr.vmem [resolvable:$true] %s533_s14 }
  0x38   :  { %544 = vmatmul.mubr.msk.f32.vlgmr.msra.gmra.mxu0 %vm96_vm0, %v68_v0  ;;  %267 = vmatpush1.msra.mxu1 %v202_v8  ;;  %v73_v8 = vld [vmem:[#allocation8 + $0x21] sm:$0x1]  ;;  %s552_s10 = sld [smem:[#allocation9 + $0x2]]  ;;  %s657_s15 = scalar_lea.vmem %s534_s14, 32 }
  0x39   :  { %222 = vrot.lane.b32.xlu0 %v69_v2, %s691_s2  ;;  %226 = vrot.lane.b32.xlu1 %v71_v5, %s691_s2  ;;  %s554_s11 = sld [smem:[#allocation9 + $0x3]]  ;;  %p658_p6 = scmp.ne.s32.totalorder %s534_s14, %s657_s15 }
  0x3a   :  { %175 = vmatprep.mubr.f32.mxu0 %v692_v6  ;;  %300 = vmatprep.mubr.f32.mxu1 %v692_v6  ;;  %s557_s12 = sld [smem:[#allocation9 + $0x4]]  ;;  %p662_p7 = scmp.lt.s32.totalorder %s534_s14, %s534_s14 }
  0x3b   :  { %571 = vset.pattern.permute.xlu1 %v693_v9  ;;  %570 = vset.pattern.permute.xlu0 %v694_v10  ;;  %p663_p8 = scmp.lt.s32.totalorder %s657_s15, %s657_s15 }
  0x3c   :  { %545 = vmatmul.mubr.msk.f32.gmra.mxu0 %vm96_vm0, %v69_v2 }
  0x3d   :  { %181 = vmatprep.mubr.f32.mxu0 %v692_v6  ;;  %217 = vperm.xlu1 %571, %v71_v5   ;;  %p664_p9 = por %p663_p8, %p662_p7 }
  0x3e   :  { %93 = vperm.xlu0 %570, %v71_v5  }
  0x3f   :  { %p665_p10 = pnand %p664_p9, %p658_p6 }
  0x40   :  { %546 = vmatmul.mubr.msk.f32.gmra.mxu0 %vm96_vm0, %v70_v1 }
  0x41   :  { %187 = vmatprep.mubr.f32.mxu0 %v692_v6  ;;  %572 = vset.pattern.permute.xlu1 %v694_v10 }
  0x42   :  { %88 = vperm.xlu1 %572, %v70_v1   ;;  %573 = vset.pattern.permute.xlu0 %v693_v9 }
  0x43   :  { %213 = vperm.xlu0 %573, %v70_v1  }
  0x44   :  { %547 = vmatmul.mubr.msk.f32.gmra.mxu0 %vm96_vm0, %v71_v5 }
  0x45   :  { %404 = vmatprep.mubr.f32.mxu0 %v692_v6 }
  0x46   :  { %83 = vperm.xlu1 %572, %v69_v2  }
  0x47   :  { %575 = vset.pattern.permute.xlu0 %v694_v10  ;;  %v335_v10 = vstv %s334_s8 }
  0x48   :  { %78 = vperm.xlu0 %575, %v68_v0  }
  0x4a   :  { %574 = vset.pattern.permute.xlu1 %v693_v9 }
  0x4b   :  { %209 = vperm.xlu1 %574, %v69_v2  }
  0x4c   :  { %576 = vset.pattern.permute.xlu0 %v693_v9 }
  0x4f   :  { %205 = vperm.xlu1 %574, %v68_v0  }
  0xa7   :  { %v221_v11 = vpop.permute.xlu0 %220  ;;  %v225_v13 = vpop.permute.xlu1 %224 }
  0xa8   :  { %548 = vmatmul.mubr.msk.f32.vlgmr.msra.gmra.mxu1 %vm96_vm0, %v221_v11 }
  0xa9   :  { %306 = vmatprep.mubr.f32.mxu1 %v692_v6 }
  0xab   :  { %v223_v12 = vpop.permute.xlu0 %222  ;;  %v227_v14 = vpop.permute.xlu1 %226 }
  0xac   :  { %549 = vmatmul.mubr.msk.f32.gmra.mxu1 %vm96_vm0, %v223_v12 }
  0xad   :  { %312 = vmatprep.mubr.f32.mxu1 %v692_v6 }
  0xb0   :  { %550 = vmatmul.mubr.msk.f32.gmra.mxu1 %vm96_vm0, %v225_v13  ;;  %v418_v13 = vstv %s555_s9 }
  0xb1   :  { %318 = vmatprep.mubr.f32.mxu1 %v692_v6 }
  0xb4   :  { %551 = vmatmul.mubr.msk.f32.gmra.mxu1 %vm96_vm0, %v227_v14 }
  0xb5   :  { %486 = vmatprep.mubr.f32.mxu1 %v692_v6 }
  0xb8   :  { %v218_v16 = vpop.permute.xlu1 %217 }
  0xb9   :  { %v94_v18 = vpop.permute.xlu0 %93 }
  0xbd   :  { %v89_v21 = vpop.permute.xlu1 %88 }
  0xbe   :  { %v214_v23 = vpop.permute.xlu0 %213 }
  0xc1   :  { %v84_v28 = vpop.permute.xlu1 %83 }
  0xc3   :  { %v79_v31 = vpop.permute.xlu0 %78 }
  0xc6   :  { %v210_v52 = vpop.permute.xlu1 %209 }
  0xca   :  { %v206_v59 = vpop.permute.xlu1 %205 }
  0xf8   :  { %v171_v15 = vpop.f32.mrf.mxu0 }
  0xf9   :  { %v172_v40 = vadd.f32 %v171_v15, %v79_v31 }
  0xfa   :  { %v173_v17 = vpop.f32.mrf.mxu0 }
  0xfb   :  { %v174_v38 = vadd.f32 %v173_v17, %v79_v31  ;;  %v194_v44 = vmax.f32 %v172_v40, 0.0 }
  0xfc   :  { %v177_v19 = vpop.f32.mrf.mxu0 }
  0xfd   :  { %v178_v35 = vadd.f32 %v177_v19, %v84_v28  ;;  %v195_v43 = vmax.f32 %v174_v38, 0.0 }
  0xfe   :  { %v179_v20 = vpop.f32.mrf.mxu0 }
  0xff   :  { %v180_v32 = vadd.f32 %v179_v20, %v84_v28  ;;  %v196_v42 = vmax.f32 %v178_v35, 0.0  ;;  %v413_v20 = vstv %s552_s10  ;;  %v501_v35 = vstv %s557_s12 }
 0x100   :  { %v183_v22 = vpop.f32.mrf.mxu0 }
 0x101   :  { %v184_v29 = vadd.f32 %v183_v22, %v89_v21  ;;  %v197_v41 = vmax.f32 %v180_v32, 0.0  ;;  %v695_v22 = vmov 1966171168  }
 0x102   :  { %v185_v24 = vpop.f32.mrf.mxu0 }
 0x103   :  { %v186_v26 = vadd.f32 %v185_v24, %v89_v21  ;;  %v198_v39 = vmax.f32 %v184_v29, 0.0  ;;  %v495_v21 = vstv %s554_s11 }
 0x104   :  { %v189_v25 = vpop.f32.mrf.mxu0 }
 0x105   :  { %v190_v27 = vadd.f32 %v189_v25, %v94_v18  ;;  %v199_v36 = vmax.f32 %v186_v26, 0.0  ;;  %v510_v26 = vlaneseq }
 0x106   :  { %v191_v30 = vpop.f32.mrf.mxu0 }
 0x107   :  { %v192_v33 = vadd.f32 %v191_v30, %v94_v18  ;;  %v200_v34 = vmax.f32 %v190_v27, 0.0  ;;  %vm524_vm2 = vcmp.lt.s32.totalorder %v510_v26, 256 }
 0x109   :  { %v201_v37 = vmax.f32 %v192_v33, 0.0 }
 0x10b   :  { %364 = vmatprep.subr.mxu0 %v201_v37 }
 0x10c   :  { %365 = vmatpush1.msra.mxu0 %v200_v34  ;;  %v511_v34 = vshrl.u32 %v510_v26, 7 }
 0x10d   :  { %366 = vmatprep.subr.mxu0 %v199_v36 }
 0x10e   :  { %367 = vmatpush1.msra.mxu0 %v198_v39 }
 0x10f   :  { %368 = vmatprep.subr.mxu0 %v197_v41 }
 0x110   :  { %369 = vmatpush1.msra.mxu0 %v196_v42 }
 0x111   :  { %370 = vmatprep.subr.mxu0 %v195_v43 }
 0x112   :  { %371 = vmatpush1.msra.mxu0 %v194_v44 }
 0x113   :  { %553 = vmatmul.mubr.msk.f32.vlgmr.msra.gmra.mxu0 %vm336_vm1, %v72_v45 }
 0x168   :  { %v302_v46 = vpop.f32.mrf.mxu1 }
 0x169   :  { %v303_v2 = vadd.f32 %v302_v46, %v206_v59 }
 0x16a   :  { %v304_v47 = vpop.f32.mrf.mxu1 }
 0x16b   :  { %v305_v0 = vadd.f32 %v304_v47, %v206_v59  ;;  %v325_v7 = vmax.f32 %v303_v2, 0.0 }
 0x16c   :  { %v308_v48 = vpop.f32.mrf.mxu1 }
 0x16d   :  { %v309_v62 = vadd.f32 %v308_v48, %v210_v52  ;;  %v326_v6 = vmax.f32 %v305_v0, 0.0 }
 0x16e   :  { %v310_v49 = vpop.f32.mrf.mxu1 }
 0x16f   :  { %v311_v60 = vadd.f32 %v310_v49, %v210_v52  ;;  %v327_v5 = vmax.f32 %v309_v62, 0.0 }
 0x170   :  { %v314_v50 = vpop.f32.mrf.mxu1 }
 0x171   :  { %v315_v58 = vadd.f32 %v314_v50, %v214_v23  ;;  %v328_v4 = vmax.f32 %v311_v60, 0.0 }
 0x172   :  { %v316_v51 = vpop.f32.mrf.mxu1 }
 0x173   :  { %v317_v56 = vadd.f32 %v316_v51, %v214_v23  ;;  %v329_v3 = vmax.f32 %v315_v58, 0.0  ;;  %v508_v23 = vunpack.c.l.s4 %v695_v22 }
 0x174   :  { %v320_v53 = vpop.f32.mrf.mxu1 }
 0x175   :  { %v321_v54 = vadd.f32 %v320_v53, %v218_v16  ;;  %v330_v1 = vmax.f32 %v317_v56, 0.0  ;;  %v509_v30 = vunpack.c.0.s8 %v508_v23 }
 0x176   :  { %v322_v55 = vpop.f32.mrf.mxu1 }
 0x177   :  { %v323_v57 = vadd.f32 %v322_v55, %v218_v16  ;;  %v331_v63 = vmax.f32 %v321_v54, 0.0  ;;  %v512_v39 = vsub.s32 %v509_v30, %v511_v34 }
 0x179   :  { %v332_v61 = vmax.f32 %v323_v57, 0.0 }
 0x17b   :  { %446 = vmatprep.subr.mxu1 %v332_v61 }
 0x17c   :  { %447 = vmatpush1.msra.mxu1 %v331_v63 }
 0x17d   :  { %448 = vmatprep.subr.mxu1 %v330_v1 }
 0x17e   :  { %449 = vmatpush1.msra.mxu1 %v329_v3 }
 0x17f   :  { %450 = vmatprep.subr.mxu1 %v328_v4 }
 0x180   :  { %451 = vmatpush1.msra.mxu1 %v327_v5 }
 0x181   :  { %452 = vmatprep.subr.mxu1 %v326_v6 }
 0x182   :  { %453 = vmatpush1.msra.mxu1 %v325_v7 }
 0x183   :  { %556 = vmatmul.mubr.msk.f32.vlgmr.msra.gmra.mxu1 %vm336_vm1, %v73_v8 }
 0x1d3   :  { %v406_v9 = vpop.f32.mrf.mxu0 }
 0x1d4   :  { %v407_v11 = vadd.f32 %v406_v9, %v335_v10 }
 0x1d5   :  { %v408_v12 = vpop.f32.mrf.mxu0 }
 0x1d6   :  { %v409_v14 = vadd.f32 %v408_v12, %v335_v10  ;;  %577 = vtanh.f32 %v407_v11 }
 0x1d8   :  { %579 = vtanh.f32 %v409_v14 }
 0x1e3   :  { %v578_v19 = vpop.eup %577 }
 0x1e4   :  { %v414_v25 = vmul.f32 %v578_v19, %v413_v20 }
 0x1e5   :  { %v580_v24 = vpop.eup %579 }
 0x1e6   :  { %v415_v31 = vmul.f32 %v580_v24, %v413_v20 }
 0x243   :  { %v488_v15 = vpop.f32.mrf.mxu1 }
 0x244   :  { %v489_v16 = vadd.f32 %v488_v15, %v418_v13 }
 0x245   :  { %v490_v17 = vpop.f32.mrf.mxu1 }
 0x246   :  { %581 = vtanh.f32 %v489_v16  ;;  %v491_v18 = vadd.f32 %v490_v17, %v418_v13 }
 0x248   :  { %583 = vtanh.f32 %v491_v18 }
 0x253   :  { %v582_v27 = vpop.eup %581 }
 0x254   :  { %v496_v28 = vmul.f32 %v582_v27, %v495_v21 }
 0x255   :  { %v584_v29 = vpop.eup %583 }
 0x256   :  { %v497_v32 = vmul.f32 %v584_v29, %v495_v21  ;;  %v498_v33 = vadd.f32 %v496_v28, %v414_v25 }
 0x258   :  { %v499_v36 = vadd.f32 %v497_v32, %v415_v31  ;;  %v502_v37 = vadd.f32 %v501_v35, %v498_v33 }
 0x25a   :  { %v503_v38 = vadd.f32 %v501_v35, %v499_v36 }
 0x25c   :  { %v506_v40 = vcombine.low %v502_v37, %v503_v38 }
 0x25e   :  { %v513_v41 = vrot.slane %v506_v40, %v512_v39 }
 0x260   :  { %v520_v42 = vrot.slane %v513_v41, %v512_v39 }
 0x262   :  { %526 = vst.msk [vmem:[#allocation10] sm:$0x3] %vm524_vm2, %v520_v42 }
 0x263   :  { %668 = shalt.err (!%p665_p10)
}
 0x264   :  { %536 = dma.vmem_to_hbm [thread:$0]  %s534_s14, 32, %s751_s4, [#allocation4]  }
 0x265   :  { %683 = dma.done.wait [#allocation4], 32  }
 0x266   :  { %684 = vsyncadd [#allocation4], 4294967264 }
 0x267   :  { %540 = vsyncpa [#allocation3], 1 }
 0x268   :  { %541 = vsyncpa [#allocation7], 1 }
 0x269   :  { %542 = vsyncpa [#allocation4], 1 }
 0x26a   :  { %543 = vsyncpa [#allocation5], 1 }

</bundles_post_ra>
